<compile_context>
chip_gen: v5e
topology: v5e:2x2
jax: 0.10.0
libtpu: 0.0.40
codegen_flags: <defaults>
</compile_context>

<pallas_src>
import functools

import jax
import jax.numpy as jnp
from jax.experimental import pallas as pl
from jax.experimental.pallas import tpu as pltpu

_MIB = 1024 * 1024


def _round_up(x, m):
    return ((x + m - 1) // m) * m


def _vmem_capacity_bytes():
    """Physical VMEM of the local TPU; conservative 64 MiB (v7x) fallback."""
    try:
        info = pltpu.get_tpu_info()
        cap = int(getattr(info, "vmem_capacity_bytes", 0))
        if cap > 0:
            return cap
    except Exception:
        pass
    return 64 * _MIB


def _fc1_kernel(x_ref, w1_ref, b1_ref, h_ref):
    # x: (TM, K1p) bf16   w1: (K1p, TH) bf16   b1: (1, TH) f32   h: (TM, TH) bf16
    h = jnp.dot(x_ref[...], w1_ref[...], preferred_element_type=jnp.float32)
    h = jnp.maximum(h + b1_ref[...], 0.0)  # fc1 + ReLU; dropout(0.2) = eval identity
    h_ref[...] = h.astype(h_ref.dtype)


def _fc2_kernel(h_ref, w2_ref, b2_ref, o_ref):
    # h: (TM, Hp) bf16   w2: (Hp, TN) bf16   b2: (1, TN) f32   o: (TM, TN) f32
    out = jnp.dot(h_ref[...], w2_ref[...], preferred_element_type=jnp.float32)
    o_ref[...] = (out + b2_ref[...]).astype(o_ref.dtype)


def _pick_tile_n(tile_m, h_pad, v128, vmem_budget, w2_bufs):
    """Largest vocab tile (multiple of 128) whose fc2 working set fits VMEM."""
    fixed = 2 * tile_m * h_pad * 2                      # double-buffered h (bf16)
    per_col = (w2_bufs * (h_pad * 2 + 8 * 4)            # w2 (bf16) + b2 (f32, 8-row pad)
               + 2 * tile_m * 4)                        # double-buffered out tile (f32)
    avail = max(vmem_budget - fixed, 128 * per_col)
    tn = (avail // per_col) // 128 * 128
    tn = int(max(128, min(tn, 4096)))
    # Keep >= 2 vocab tiles whenever possible so the v7x megacore can split the
    # (parallel) vocab axis even at batch-tile count 1; extra step cost ~0.35us.
    two_tile_cap = max(128, (v128 // 2) // 128 * 128)
    return int(min(tn, two_tile_cap, v128))


@functools.partial(jax.jit, static_argnames=("tile_m", "tile_n"))
def ffnn_lm_forward(tokens, emb_table, w1, b1, w2, b2, *, tile_m=None, tile_n=None):
    """Forward pass of FFNNLanguageModel.

    tokens    : (B, n_gram) int32
    emb_table : (V, E) f32
    w1        : (n_gram*E, H) f32, b1: (H,) f32   (weights stored as (in, out))
    w2        : (H, V) f32,        b2: (V,) f32
    returns   : (B, V) f32 logits
    """
    B, _ = tokens.shape
    _, E = emb_table.shape
    K1, H = w1.shape
    _, Vout = w2.shape

    # Embedding lookup + flatten; cast AFTER the gather so the full (V, E)
    # table is never rewritten to HBM in bf16.
    feats = jnp.take(emb_table, tokens, axis=0).reshape(B, K1).astype(jnp.bfloat16)

    # ---- generation-aware tiling -------------------------------------------
    cap = _vmem_capacity_bytes()
    budget = min(cap - 8 * _MIB, (cap * 7) // 8)        # ~56 MiB v7x, ~112 MiB v5e/v6e
    vmem_limit = int(min(cap - 4 * _MIB, budget + 8 * _MIB))
    w2_bufs = 3 if budget >= 96 * _MIB else 2           # deeper w2 stream off-v7x

    if tile_m is None:
        tile_m = min(_round_up(B, 16), 512)             # bf16 packs 16 rows / vreg
    tile_m = _round_up(int(tile_m), 16)
    b_pad = _round_up(B, tile_m)
    k1_pad = _round_up(K1, 128)
    h_pad = _round_up(H, 128)
    v128 = _round_up(Vout, 128)
    if tile_n is None:
        tile_n = _pick_tile_n(tile_m, h_pad, v128, budget, w2_bufs)
    tile_n = min(_round_up(int(tile_n), 128), v128)
    v_pad = _round_up(v128, tile_n)
    # Hidden tile for fc1: largest multiple of 128 (<=1024) that divides h_pad.
    tile_h = min(h_pad, 1024)
    while h_pad % tile_h:
        tile_h -= 128

    # ---- zero padding (exact; removed by the final slice) -------------------
    feats_p = jnp.pad(feats, ((0, b_pad - B), (0, k1_pad - K1)))
    w1_p = jnp.pad(w1.astype(jnp.bfloat16), ((0, k1_pad - K1), (0, h_pad - H)))
    b1_p = jnp.pad(b1, (0, h_pad - H)).reshape(1, h_pad)
    w2_p = jnp.pad(w2.astype(jnp.bfloat16), ((0, h_pad - H), (0, v_pad - Vout)))
    b2_p = jnp.pad(b2, (0, v_pad - Vout)).reshape(1, v_pad)

    # ---- kernel 1: fc1 + ReLU (tiny) ----------------------------------------
    h_bf16 = pl.pallas_call(
        _fc1_kernel,
        out_shape=jax.ShapeDtypeStruct((b_pad, h_pad), jnp.bfloat16),
        grid=(b_pad // tile_m, h_pad // tile_h),
        in_specs=[
            pl.BlockSpec((tile_m, k1_pad), lambda i, j: (i, 0)),
            pl.BlockSpec((k1_pad, tile_h), lambda i, j: (0, j)),
            pl.BlockSpec((1, tile_h), lambda i, j: (0, j)),
        ],
        out_specs=pl.BlockSpec((tile_m, tile_h), lambda i, j: (i, j)),
        compiler_params=pltpu.CompilerParams(
            dimension_semantics=("parallel", "parallel"),
            vmem_limit_bytes=vmem_limit,
        ),
        cost_estimate=pl.CostEstimate(
            flops=2 * b_pad * k1_pad * h_pad,
            transcendentals=0,
            bytes_accessed=(b_pad * k1_pad * 2 + k1_pad * h_pad * 2
                            + h_pad * 4 + b_pad * h_pad * 2),
        ),
    )(feats_p, w1_p, b1_p)

    # ---- kernel 2: fc2 (dominant, HBM-BW bound on w2) ------------------------
    n_vt = v_pad // tile_n
    n_bt = b_pad // tile_m
    # Deeper buffering of the streamed w2/b2 only when VMEM is plentiful
    # (v5e/v6e); keep the default double-buffering on v7x's 64 MiB VMEM.
    stream_kw = {"pipeline_mode": pl.Buffered(w2_bufs)} if w2_bufs != 2 else {}

    logits = pl.pallas_call(
        _fc2_kernel,
        out_shape=jax.ShapeDtypeStruct((b_pad, v_pad), jnp.float32),
        # vocab axis OUTERMOST: w2's block index depends only on it, so each
        # (h_pad, tile_n) slab is DMA'd exactly once regardless of batch tiles.
        grid=(n_vt, n_bt),
        in_specs=[
            pl.BlockSpec((tile_m, h_pad), lambda j, i: (i, 0)),              # h
            pl.BlockSpec((h_pad, tile_n), lambda j, i: (0, j), **stream_kw),  # w2
            pl.BlockSpec((1, tile_n), lambda j, i: (0, j), **stream_kw),      # b2
        ],
        out_specs=pl.BlockSpec((tile_m, tile_n), lambda j, i: (i, j)),
        compiler_params=pltpu.CompilerParams(
            dimension_semantics=("parallel", "parallel"),
            vmem_limit_bytes=vmem_limit,
        ),
        cost_estimate=pl.CostEstimate(
            flops=2 * b_pad * h_pad * v_pad,
            transcendentals=0,
            bytes_accessed=(h_pad * v_pad * 2          # w2 streamed once
                            + n_vt * b_pad * h_pad * 2  # h re-read per vocab tile
                            + v_pad * 4                 # b2
                            + b_pad * v_pad * 4),       # logits
        ),
    )(h_bf16, w2_p, b2_p)

    return logits[:B, :Vout]


def init_params(key, vocab_size, embedding_dim, hidden_dim, n_gram):
    """Deterministic parameter init mirroring the module's shapes."""
    k_emb, k_w1, k_b1, k_w2, k_b2 = jax.random.split(key, 5)
    in1 = n_gram * embedding_dim
    emb_table = jax.random.normal(k_emb, (vocab_size, embedding_dim), jnp.float32)
    # nn.Linear-style uniform init, stored as (in_features, out_features).
    lim1 = 1.0 / (in1 ** 0.5)
    w1 = jax.random.uniform(k_w1, (in1, hidden_dim), jnp.float32, -lim1, lim1)
    b1 = jax.random.uniform(k_b1, (hidden_dim,), jnp.float32, -lim1, lim1)
    lim2 = 1.0 / (hidden_dim ** 0.5)
    w2 = jax.random.uniform(k_w2, (hidden_dim, vocab_size), jnp.float32, -lim2, lim2)
    b2 = jax.random.uniform(k_b2, (vocab_size,), jnp.float32, -lim2, lim2)
    return emb_table, w1, b1, w2, b2


if __name__ == "__main__":
    vocab_size = 256
    embedding_dim = 32
    hidden_dim = 64
    n_gram = 4
    batch = 8

    key = jax.random.PRNGKey(0)
    k_params, k_tok = jax.random.split(key)
    emb_table, w1, b1, w2, b2 = init_params(
        k_params, vocab_size, embedding_dim, hidden_dim, n_gram
    )
    tokens = jax.random.randint(k_tok, (batch, n_gram), 0, vocab_size, jnp.int32)

    # At V=256 the auto tile picker keeps two 128-wide vocab tiles, so the
    # streamed-w2 path and the 2-D fc2 grid are exercised even at toy shapes.
    logits = ffnn_lm_forward(tokens, emb_table, w1, b1, w2, b2)
    logits = jax.block_until_ready(logits)

    # Pure-JAX reference with matching bf16-operand / f32-accumulate numerics.
    feats_check = jnp.take(emb_table, tokens, axis=0).reshape(batch, -1).astype(jnp.bfloat16)
    h_check = jnp.maximum(
        jnp.dot(feats_check, w1.astype(jnp.bfloat16),
                preferred_element_type=jnp.float32) + b1,
        0.0,
    ).astype(jnp.bfloat16)
    ref = jnp.dot(h_check, w2.astype(jnp.bfloat16),
                  preferred_element_type=jnp.float32) + b2

    assert logits.shape == (batch, vocab_size)
    assert jnp.allclose(logits, ref, atol=1e-2, rtol=1e-2), (
        float(jnp.max(jnp.abs(logits - ref)))
    )

    print("KERNEL_OK")
</pallas_src>

<mosaic_0001>
module attributes {stable_mosaic.version = 11 : i64} {
  func.func @_fc1_kernel(%arg0: i32, %arg1: i32, %arg2: memref<16x128xbf16, #tpu.memory_space<vmem>>, %arg3: memref<128x128xbf16, #tpu.memory_space<vmem>>, %arg4: memref<1x128xf32, #tpu.memory_space<vmem>>, %arg5: memref<16x128xbf16, #tpu.memory_space<vmem>>) attributes {dimension_semantics = [#tpu.dimension_semantics<parallel>, #tpu.dimension_semantics<parallel>], iteration_bounds = array<i64: 1, 1>, scalar_prefetch = 0 : i64, scratch_operands = 0 : i64, tpu.core_type = #tpu.core_type<tc>, window_params = [{transform_indices = @transform_0, window_bounds = array<i64: 16, 128>}, {transform_indices = @transform_1, window_bounds = array<i64: 128, 128>}, {transform_indices = @transform_2, window_bounds = array<i64: 1, 128>}, {transform_indices = @transform_3, window_bounds = array<i64: 16, 128>}]} {
    %c0 = arith.constant 0 : index
    %c0_0 = arith.constant 0 : index
    %0 = vector.load %arg2[%c0, %c0_0] : memref<16x128xbf16, #tpu.memory_space<vmem>>, vector<16x128xbf16>
    %c0_1 = arith.constant 0 : index
    %c0_2 = arith.constant 0 : index
    %1 = vector.load %arg3[%c0_1, %c0_2] : memref<128x128xbf16, #tpu.memory_space<vmem>>, vector<128x128xbf16>
    %cst = arith.constant dense<0.000000e+00> : vector<16x128xf32>
    %2 = tpu.matmul %0, %1, %cst {dimension_numbers = #tpu.dot_dimension_numbers<[1], [0], [0], [1], [0, 0, 1, 1], [], []>} : vector<16x128xbf16>, vector<128x128xbf16>, vector<16x128xf32> -> vector<16x128xf32>
    %c0_3 = arith.constant 0 : index
    %c0_4 = arith.constant 0 : index
    %3 = vector.load %arg4[%c0_3, %c0_4] : memref<1x128xf32, #tpu.memory_space<vmem>>, vector<1x128xf32>
    %4 = vector.broadcast %3 : vector<1x128xf32> to vector<16x128xf32>
    %5 = arith.addf %2, %4 : vector<16x128xf32>
    %cst_5 = arith.constant 0.000000e+00 : f32
    %6 = vector.broadcast %cst_5 : f32 to vector<16x128xf32>
    %7 = arith.maximumf %5, %6 : vector<16x128xf32>
    %8 = arith.truncf %7 : vector<16x128xf32> to vector<16x128xbf16>
    %c0_6 = arith.constant 0 : index
    %c0_7 = arith.constant 0 : index
    %9 = vector.load %arg5[%c0_6, %c0_7] : memref<16x128xbf16, #tpu.memory_space<vmem>>, vector<16x128xbf16>
    tpu.vector_store %arg5[%c0_6, %c0_7], %8 {strides = array<i32>} : memref<16x128xbf16, #tpu.memory_space<vmem>>, vector<16x128xbf16>,
    return
  }
  func.func @transform_0(%arg0: i32, %arg1: i32) -> (i32, i32) {
    %c0_i32 = arith.constant 0 : i32
    %c0_i32_0 = arith.constant 0 : i32
    return %arg0, %c0_i32 : i32, i32
  }
  func.func @transform_1(%arg0: i32, %arg1: i32) -> (i32, i32) {
    %c0_i32 = arith.constant 0 : i32
    %c0_i32_0 = arith.constant 0 : i32
    return %c0_i32, %arg1 : i32, i32
  }
  func.func @transform_2(%arg0: i32, %arg1: i32) -> (i32, i32) {
    %c0_i32 = arith.constant 0 : i32
    %c0_i32_0 = arith.constant 0 : i32
    return %c0_i32, %arg1 : i32, i32
  }
  func.func @transform_3(%arg0: i32, %arg1: i32) -> (i32, i32) {
    %c0_i32 = arith.constant 0 : i32
    return %arg0, %arg1 : i32, i32
  }
}

module attributes {stable_mosaic.version = 11 : i64} {
  func.func @_fc2_kernel(%arg0: i32, %arg1: i32, %arg2: memref<16x128xbf16, #tpu.memory_space<vmem>>, %arg3: memref<128x128xbf16, #tpu.memory_space<vmem>>, %arg4: memref<1x128xf32, #tpu.memory_space<vmem>>, %arg5: memref<16x128xf32, #tpu.memory_space<vmem>>) attributes {dimension_semantics = [#tpu.dimension_semantics<parallel>, #tpu.dimension_semantics<parallel>], iteration_bounds = array<i64: 2, 1>, scalar_prefetch = 0 : i64, scratch_operands = 0 : i64, tpu.core_type = #tpu.core_type<tc>, window_params = [{transform_indices = @transform_0, window_bounds = array<i64: 16, 128>}, {transform_indices = @transform_1, window_bounds = array<i64: 128, 128>}, {transform_indices = @transform_2, window_bounds = array<i64: 1, 128>}, {transform_indices = @transform_3, window_bounds = array<i64: 16, 128>}]} {
    %c0 = arith.constant 0 : index
    %c0_0 = arith.constant 0 : index
    %0 = vector.load %arg2[%c0, %c0_0] : memref<16x128xbf16, #tpu.memory_space<vmem>>, vector<16x128xbf16>
    %c0_1 = arith.constant 0 : index
    %c0_2 = arith.constant 0 : index
    %1 = vector.load %arg3[%c0_1, %c0_2] : memref<128x128xbf16, #tpu.memory_space<vmem>>, vector<128x128xbf16>
    %cst = arith.constant dense<0.000000e+00> : vector<16x128xf32>
    %2 = tpu.matmul %0, %1, %cst {dimension_numbers = #tpu.dot_dimension_numbers<[1], [0], [0], [1], [0, 0, 1, 1], [], []>} : vector<16x128xbf16>, vector<128x128xbf16>, vector<16x128xf32> -> vector<16x128xf32>
    %c0_3 = arith.constant 0 : index
    %c0_4 = arith.constant 0 : index
    %3 = vector.load %arg4[%c0_3, %c0_4] : memref<1x128xf32, #tpu.memory_space<vmem>>, vector<1x128xf32>
    %4 = vector.broadcast %3 : vector<1x128xf32> to vector<16x128xf32>
    %5 = arith.addf %2, %4 : vector<16x128xf32>
    %c0_5 = arith.constant 0 : index
    %c0_6 = arith.constant 0 : index
    %6 = vector.load %arg5[%c0_5, %c0_6] : memref<16x128xf32, #tpu.memory_space<vmem>>, vector<16x128xf32>
    tpu.vector_store %arg5[%c0_5, %c0_6], %5 {strides = array<i32>} : memref<16x128xf32, #tpu.memory_space<vmem>>, vector<16x128xf32>,
    return
  }
  func.func @transform_0(%arg0: i32, %arg1: i32) -> (i32, i32) {
    %c0_i32 = arith.constant 0 : i32
    %c0_i32_0 = arith.constant 0 : i32
    return %arg1, %c0_i32 : i32, i32
  }
  func.func @transform_1(%arg0: i32, %arg1: i32) -> (i32, i32) {
    %c0_i32 = arith.constant 0 : i32
    %c0_i32_0 = arith.constant 0 : i32
    return %c0_i32, %arg0 : i32, i32
  }
  func.func @transform_2(%arg0: i32, %arg1: i32) -> (i32, i32) {
    %c0_i32 = arith.constant 0 : i32
    %c0_i32_0 = arith.constant 0 : i32
    return %c0_i32, %arg0 : i32, i32
  }
  func.func @transform_3(%arg0: i32, %arg1: i32) -> (i32, i32) {
    %c0_i32 = arith.constant 0 : i32
    return %arg1, %arg0 : i32, i32
  }
}

</mosaic_0001>

<bundles_post_ra>
// kernel: ffnn_lm_forward.2
= control target key start
LH: loop header
LB: loop body
LE: loop exit
PB: predicated region body
PF: predicated region fallthrough
CT: control target
= control target key end

     0   :  { %s218_s1 = inlined_call_operand.vmem [shape: bf16[128,128], index: 1, kind: input, shape index: {}]   ;;  %s219_s2 = inlined_call_operand.vmem [shape: f32[1,128], index: 2, kind: input, shape index: {}]   ;;  %s220_s0 = inlined_call_operand.vmem [shape: bf16[16,128], index: 0, kind: input, shape index: {}]   ;;  %s221_s3 = inlined_call_operand.vmem [shape: bf16[16,128], index: 3, kind: output, shape index: {}]  }
   0x1   :  { %v158_v0 = vld [vmem:[%s218_s1 + $0x38] sm:$0xff]  ;;  %v157_v1 = vld [vmem:[%s218_s1 + $0x30] sm:$0xff]  ;;  %v156_v2 = vld [vmem:[%s218_s1 + $0x28] sm:$0xff] }
   0x2   :  { %90 = vmatpush.bf16.msra.mxu0 %v158_v0  ;;  %v155_v3 = vld [vmem:[%s218_s1 + $0x20] sm:$0xff]  ;;  %v154_v4 = vld [vmem:[%s218_s1 + $0x18] sm:$0xff]  ;;  %v153_v5 = vld [vmem:[%s218_s1 + $0x10] sm:$0xff] }
   0x3   :  { %v152_v6 = vld [vmem:[%s218_s1 + $0x8] sm:$0xff]  ;;  %v151_v7 = vld [vmem:[%s218_s1] sm:$0xff] }
   0x4   :  { %v150_v8 = vld [vmem:[%s220_s0] sm:$0xff] }
   0x5   :  { %v164_v10 = vld [vmem:[%s219_s2] ss:$0 sm:$0xff] }
   0x6   :  { %91 = vmatpush.bf16.msra.mxu0 %v157_v1 }
   0xa   :  { %92 = vmatpush.bf16.msra.mxu0 %v156_v2 }
   0xe   :  { %93 = vmatpush.bf16.msra.mxu0 %v155_v3 }
  0x12   :  { %94 = vmatpush.bf16.msra.mxu0 %v154_v4 }
  0x16   :  { %95 = vmatpush.bf16.msra.mxu0 %v153_v5 }
  0x1a   :  { %96 = vmatpush.bf16.msra.mxu0 %v152_v6 }
  0x1e   :  { %97 = vmatpush.bf16.msra.mxu0 %v151_v7 }
  0x21   :  { %98 = vmatmul.bf16.vlgmr.msra.gmra.mxu0 %v150_v8 }
  0x9e   :  { %v99_v9 = vpop.f32.mrf.mxu0 }
  0x9f   :  { %v100_v11 = vadd.f32 %v164_v10, %v99_v9 }
  0xa1   :  { %v104_v14 = vmax.f32 %v100_v11, 0.0 }
  0xa6   :  { %v101_v12 = vpop.f32.mrf.mxu0 }
  0xa7   :  { %v102_v13 = vadd.f32 %v164_v10, %v101_v12 }
  0xa9   :  { %v105_v15 = vmax.f32 %v102_v13, 0.0 }
  0xab   :  { %v162_v16 = vpack.c.bf16 %v105_v15, %v104_v14 }
  0xad   :  { %163 = vst [vmem:[%s221_s3] sm:$0xff] %v162_v16  }

// kernel: ffnn_lm_forward.3
= control target key start
LH: loop header
LB: loop body
LE: loop exit
PB: predicated region body
PF: predicated region fallthrough
CT: control target
= control target key end

     0   :  { %s711_s12 = smov 0   ;;  %s713_s13 = smov 0   ;;  %s809_s0 = inlined_call_operand.vmem [shape: bf16[16,128], index: 0, kind: input, shape index: {}]   ;;  %s810_s1 = inlined_call_operand.vmem [shape: bf16[128,256], index: 1, kind: input, shape index: {}]   ;;  %s811_s2 = inlined_call_operand.vmem [shape: f32[1,256], index: 2, kind: input, shape index: {}]   ;;  %s812_s3 = inlined_call_operand.vmem [shape: f32[16,256], index: 3, kind: output, shape index: {}]  }
   0x1   :  { %s715_s14 = smov 0   ;;  %s717_s15 = smov 0  }
   0x2   :  { %s719_s16 = smov 0  }
   0x3 LB: > { %s25_s17 = sadd.s32 1, %s685_s15  ;;  %s551_s18 = sadd.s32 4294967295, %s689_s16   ;;  %s689_s16 = sphi %s719_s16, %s13_s16   ;;  %s685_s15 = sphi %s717_s15, %s817_s15   ;;  %s681_s14 = sphi %s715_s14, %s816_s14   ;;  %s677_s13 = sphi %s713_s13, %s815_s13   ;;  %s673_s12 = sphi %s711_s12, %s814_s12  }
   0x4   : > { %p27_p0 = scmp.ge.s32.totalorder %s25_s17, 2  ;;  %p65_p1 = scmp.ne.s32.totalorder %s677_s13, %s673_s12 }
   0x5   : > { %p66_p2 = scmp.eq.s32.totalorder %s689_s16, 0  ;;  %p123_p4 = scmp.eq.s32.totalorder %s551_s18, 1 }
   0x6   : > { %s819_s17 = smov (%p27_p0, %s25_s17), 0  ;;  %s58_s20 = sadd.s32 1, %s677_s13 }
   0x7   : > { %p67_p3 = por %p66_p2, %p65_p1  ;;  %s55_s19 = ssub.s32 %s685_s15, %s819_s17 }
   0x8   : > { %p56_p5 = scmp.eq.s32.totalorder %s55_s19, 0  ;;  %p746_p6 = por %p123_p4, %p65_p1 }
   0x9   : > { %p555_p7 = scmp.ge.s32.totalorder %s689_s16, 2 }
   0xa   : > { %s751_s22 = scalar_select %p56_p5, %s677_s13, %s58_s20  }
   0xb   : > { %154 = sbr.rel (%p555_p7) target bundleno = 36 (0x24), region = 20 }
  0x10   : > { %157 = sbr.rel (!%p67_p3) target bundleno = 36 (0x24), region = 24  ;;  %s159_s23 = sand.u32 (%p67_p3), 1, %s677_s13  }
  0x11   : > { %s557_s24 = sshll.u32 (%p67_p3), %s685_s15, 2  ;;  %s556_s25 = sshll.u32 (%p67_p3), %s159_s23, 6 }
  0x12   : > { %s759_s28 = scalar_lea.vmem (%p67_p3), %s810_s1, %s557_s24  ;;  %s161_s29 = scalar_lea.vmem (%p67_p3), [#allocation2], %s556_s25 }
  0x13   : > { %v180_v0 = vld [vmem:[%s759_s28] sm:$0xf] (%p67_p3)  ;;  %v182_v1 = vld [vmem:[%s759_s28 + $0x8] sm:$0xf] (%p67_p3)  ;;  %v184_v2 = vld [vmem:[%s759_s28 + $0x10] sm:$0xf] (%p67_p3) }
  0x14   : > { %181 = vst [vmem:[%s161_s29] sm:$0xf] (%p67_p3), %v180_v0  ;;  %v186_v3 = vld [vmem:[%s759_s28 + $0x18] sm:$0xf] (%p67_p3)  ;;  %v188_v4 = vld [vmem:[%s759_s28 + $0x20] sm:$0xf] (%p67_p3) }
  0x15   : > { %183 = vst [vmem:[%s161_s29 + $0x4] sm:$0xf] %v182_v1  ;;  %v190_v5 = vld [vmem:[%s759_s28 + $0x28] sm:$0xf]  ;;  %v192_v6 = vld [vmem:[%s759_s28 + $0x30] sm:$0xf] }
  0x16   : > { %185 = vst [vmem:[%s161_s29 + $0x8] sm:$0xf] %v184_v2  ;;  %v194_v7 = vld [vmem:[%s759_s28 + $0x38] sm:$0xf]  ;;  %v196_v8 = vld [vmem:[%s759_s28 + $0x40] sm:$0xf] }
  0x17   : > { %187 = vst [vmem:[%s161_s29 + $0xc] sm:$0xf] %v186_v3  ;;  %v198_v9 = vld [vmem:[%s759_s28 + $0x48] sm:$0xf]  ;;  %v200_v10 = vld [vmem:[%s759_s28 + $0x50] sm:$0xf] }
  0x18   : > { %189 = vst [vmem:[%s161_s29 + $0x10] sm:$0xf] %v188_v4  ;;  %v202_v11 = vld [vmem:[%s759_s28 + $0x58] sm:$0xf]  ;;  %v204_v12 = vld [vmem:[%s759_s28 + $0x60] sm:$0xf] }
  0x19   : > { %191 = vst [vmem:[%s161_s29 + $0x14] sm:$0xf] %v190_v5  ;;  %v206_v13 = vld [vmem:[%s759_s28 + $0x68] sm:$0xf]  ;;  %v208_v14 = vld [vmem:[%s759_s28 + $0x70] sm:$0xf] }
  0x1a   : > { %193 = vst [vmem:[%s161_s29 + $0x18] sm:$0xf] %v192_v6  ;;  %v210_v15 = vld [vmem:[%s759_s28 + $0x78] sm:$0xf] }
  0x1b   : > { %195 = vst [vmem:[%s161_s29 + $0x1c] sm:$0xf] %v194_v7 }
  0x1c   : > { %197 = vst [vmem:[%s161_s29 + $0x20] sm:$0xf] %v196_v8 }
  0x1d   : > { %199 = vst [vmem:[%s161_s29 + $0x24] sm:$0xf] %v198_v9 }
  0x1e   : > { %201 = vst [vmem:[%s161_s29 + $0x28] sm:$0xf] %v200_v10 }
  0x1f   : > { %203 = vst [vmem:[%s161_s29 + $0x2c] sm:$0xf] %v202_v11 }
  0x20   : > { %205 = vst [vmem:[%s161_s29 + $0x30] sm:$0xf] %v204_v12 }
  0x21   : > { %207 = vst [vmem:[%s161_s29 + $0x34] sm:$0xf] %v206_v13 }
  0x22   : > { %209 = vst [vmem:[%s161_s29 + $0x38] sm:$0xf] %v208_v14 }
  0x23   : > { %211 = vst [vmem:[%s161_s29 + $0x3c] sm:$0xf] %v210_v15 }
  0x24 PF: > { %p558_p8 = scmp.ge.s32.totalorder %s689_s16, 1  ;;  %p272_p9 = scmp.lt.s32.totalorder %s689_s16, 3 }
  0x26   : > { %p273_p10 = pnand %p558_p8, %p272_p9 }
  0x27   : > { %s279_s30 = sand.u32 (!%p273_p10), 1, %s673_s12   ;;  %p315_p11 = scmp.lt.s32.totalorder (!%p273_p10), %s681_s14, 1 }
  0x28   : > { %276 = sbr.rel (%p273_p10) target bundleno = 222 (0xde), region = 69  ;;  %s559_s4 = sshll.u32 (!%p273_p10), %s279_s30, 6 }
  0x29   : > { %s281_s5 = scalar_lea.vmem (!%p273_p10), [#allocation2], %s559_s4  ;;  %s560_s12 = sshll.u32 (!%p273_p10), %s279_s30, 4 }
  0x2a   : > { %s308_s18 = scalar_lea.vmem (!%p273_p10), [#allocation3], %s560_s12 }
  0x2d   : > { %v609_v16 = vld [vmem:[%s281_s5 + $0x38] sm:$0xff]  ;;  %s316_s6 = scalar_select %p315_p11, %s681_s14, 1  ;;  %v608_v17 = vld [vmem:[%s281_s5 + $0x30] sm:$0xff]  ;;  %v607_v18 = vld [vmem:[%s281_s5 + $0x28] sm:$0xff] }
  0x2e   : > { %395 = vmatpush.bf16.msra.mxu0 %v609_v16  ;;  %v606_v19 = vld [vmem:[%s281_s5 + $0x20] sm:$0xff]  ;;  %v605_v20 = vld [vmem:[%s281_s5 + $0x18] sm:$0xff]  ;;  %v604_v21 = vld [vmem:[%s281_s5 + $0x10] sm:$0xff]  ;;  %s598_s19 = sshll.u32 (%p746_p6), %s681_s14, 3 }
  0x2f   : > { %s317_s9 = scalar_lea.vmem %s811_s2, %s316_s6  ;;  %v603_v22 = vld [vmem:[%s281_s5 + $0x8] sm:$0xff]  ;;  %v602_v23 = vld [vmem:[%s281_s5] sm:$0xff]  ;;  %s422_s24 = scalar_lea.vmem (%p746_p6), %s812_s3, %s598_s19 }
  0x30   : > { %v601_v24 = vld [vmem:[%s809_s0] sm:$0xff] }
  0x31   : > { %v650_v25 = vld [vmem:[%s317_s9] ss:$0 sm:$0xff] }
  0x32   : > { %396 = vmatpush.bf16.msra.mxu0 %v608_v17 }
  0x36   : > { %397 = vmatpush.bf16.msra.mxu0 %v607_v18 }
  0x3a   : > { %398 = vmatpush.bf16.msra.mxu0 %v606_v19 }
  0x3e   : > { %399 = vmatpush.bf16.msra.mxu0 %v605_v20 }
  0x42   : > { %400 = vmatpush.bf16.msra.mxu0 %v604_v21 }
  0x46   : > { %401 = vmatpush.bf16.msra.mxu0 %v603_v22 }
  0x4a   : > { %402 = vmatpush.bf16.msra.mxu0 %v602_v23 }
  0x4d   : > { %403 = vmatmul.bf16.vlgmr.msra.gmra.mxu0 %v601_v24 }
  0xca   : > { %v404_v26 = vpop.f32.mrf.mxu0 }
  0xcb   : > { %v405_v27 = vadd.f32 %v650_v25, %v404_v26 }
  0xcd   : > { %409 = vst [vmem:[%s308_s18] sm:$0xff] %v405_v27 }
  0xd1   : > { %417 = sbr.rel (!%p746_p6) target bundleno = 222 (0xde), region = 77 }
  0xd2   : > { %v406_v28 = vpop.f32.mrf.mxu0 }
  0xd3   : > { %v407_v29 = vadd.f32 %v650_v25, %v406_v28 }
  0xd4   : > { %v453_v30 = vld [vmem:[%s308_s18] sm:$0xff] (%p746_p6) }
  0xd5   : > { %410 = vst [vmem:[%s308_s18 + $0x8] sm:$0xff] %v407_v29 }
  0xd6   : > { %454 = vst [vmem:[%s422_s24] sm:$0xff] %v453_v30 }
  0xdc   : > { %v455_v31 = vld [vmem:[%s308_s18 + $0x8] sm:$0xff] }
  0xdd   : > { %456 = vst [vmem:[%s422_s24 + $0x10] sm:$0xff] %v455_v31 }
  0xde PF: > { %s13_s16 = sadd.s32 1, %s689_s16   ;;  %s814_s12 = smov %s677_s13 }
  0xdf   : > { %p10_p12 = scmp.ge.s32.totalorder %s13_s16, 4   ;;  %s815_s13 = smov %s751_s22 }
  0xe0   : > { %s816_s14 = smov %s685_s15  ;;  %s817_s15 = smov %s819_s17 }
  0xe1   :  { %12 = sbr.rel (!%p10_p12) target bundleno = 3 (0x3), region = 152 }

</bundles_post_ra>
